<compile_context>
chip_gen: v6e
topology: v6e:2x2x1
jax: 0.10.0
libtpu: 0.0.40
codegen_flags: <defaults>
</compile_context>

<pallas_src>
import functools
import math

import jax
import jax.numpy as jnp
from jax.experimental import pallas as pl
from jax.experimental.pallas import tpu as pltpu

_EXP_HALF_PI = math.exp(math.pi / 2.0)     # compile-time constant ~4.8105
_TARGET_BLOCK_BYTES = 4 * 1024 * 1024      # per input block, in native dtype

# Degree-9 odd polynomial for sin(t) on [0, pi/2]: Chebyshev economization of
# the degree-11 Taylor series over [-pi/2, pi/2]; max abs error ~6e-8.
_S1 = 0.9999999753886
_S3 = -0.16666646717
_S5 = 0.008332880566
_S7 = -1.9799327e-4
_S9 = 2.5857369e-6


def _sin_poly(t):
    """sin(t) for t in [0, pi/2] (degree-9 economized poly, VPU-cheap)."""
    t2 = t * t
    p = _S9
    p = p * t2 + _S7
    p = p * t2 + _S5
    p = p * t2 + _S3
    p = p * t2 + _S1
    return t * p


@functools.lru_cache(maxsize=None)
def _tpu_config():
    """Return (vmem_limit_bytes, bf16_vpu_ok) for the current backend."""
    try:
        kind = jax.devices()[0].device_kind.lower()
    except Exception:
        kind = ""
    # v5e and older have no bf16 VPU/EUP -> keep f32 in-register math there.
    bf16_vpu = not any(t in kind for t in ("v2", "v3", "v4", "v5"))
    try:
        vmem_cap = int(pltpu.get_tpu_info().vmem_capacity_bytes)
    except Exception:
        vmem_cap = (64 if "v7" in kind else 128) * 1024 * 1024
    # Leave headroom for compiler-internal scratch: <=3/4 physical, <=64 MiB.
    vmem_limit = min(64 * 1024 * 1024, (vmem_cap * 3) // 4)
    return vmem_limit, bf16_vpu


def _aa_relu_kernel(alpha_ref, x_ref, o_ref, *, compute_dtype):
    cdt = compute_dtype
    alpha32 = alpha_ref[0]                          # f32 scalar from SMEM (>0)
    alpha = alpha32.astype(cdt)
    inv_alpha = (1.0 / alpha32).astype(cdt)         # hoisted scalar reciprocal
    upper = (alpha32 * _EXP_HALF_PI).astype(cdt)    # alpha * e^{pi/2}
    two_alpha = (2.0 * alpha32).astype(cdt)

    x = x_ref[...].astype(cdt)                      # native dtype in HBM

    # log argument clamped to [1, e^{pi/2}] -> t in [0, pi/2]; also keeps any
    # garbage in a ragged (out-of-bounds) last block numerically tame.
    ratio = jnp.clip(x * inv_alpha, 1.0, _EXP_HALF_PI)
    t = jnp.log(ratio.astype(jnp.float32)).astype(cdt)   # EUP log kept in f32
    transformed = alpha * _sin_poly(t) + alpha

    # Branch selection compares x directly against alpha / upper with strict
    # inequalities, matching the PyTorch masked updates.  maximum(x, 0) covers
    # both x<=0 (-> 0) and 0<x<=alpha (-> unchanged) in one op.
    mid = (x > alpha) & (x < upper)
    y = jnp.where(
        x > upper,
        two_alpha,
        jnp.where(mid, transformed, jnp.maximum(x, 0.0)),
    )
    o_ref[...] = y.astype(o_ref.dtype)


def aa_relu_reference(x: jax.Array, alpha: jax.Array,
                      compute_dtype=jnp.float32) -> jax.Array:
    """Pure-jnp reference; mirrors the kernel's compute dtype for boundaries."""
    cdt = compute_dtype
    a32 = alpha.reshape(-1)[0].astype(jnp.float32)
    a = a32.astype(cdt)
    upper = (a32 * _EXP_HALF_PI).astype(cdt)
    two_a = (2.0 * a32).astype(cdt)
    xc = x.astype(cdt)
    ratio = jnp.clip(xc / a, 1.0, _EXP_HALF_PI)
    transformed = a * jnp.sin(jnp.log(ratio.astype(jnp.float32))).astype(cdt) + a
    y = jnp.where(xc <= 0, jnp.zeros_like(xc), xc)
    y = jnp.where((xc > a) & (xc < upper), transformed, y)
    y = jnp.where(xc > upper, two_a, y)
    return y.astype(x.dtype)


def aa_relu(x: jax.Array, alpha: jax.Array, *, donate: bool = False) -> jax.Array:
    """Apply AA_ReLU element-wise. x: any shape (e.g. NCHW), alpha: shape (1,)."""
    orig_shape, orig_dtype = x.shape, x.dtype
    n = x.size
    alpha32 = alpha.reshape(-1).astype(jnp.float32)

    vmem_limit, bf16_vpu = _tpu_config()
    cdt = jnp.bfloat16 if (orig_dtype == jnp.bfloat16 and bf16_vpu) else jnp.float32

    if n < 128:
        # Too small for a lane-dense tile; a kernel launch costs more than jnp.
        return aa_relu_reference(x, alpha32, compute_dtype=cdt)

    xf = x.reshape(-1)                       # contiguous reshape: free

    # Widest last dim (multiple of 128, <= 4096) that divides n exactly:
    # no pad, no slicing, no extra HBM passes.
    max_w = min(4096, (n // 128) * 128)
    width = 0
    for w in range(max_w, 127, -128):
        if n % w == 0:
            width = w
            break

    tail_out = None
    if width == 0:
        # Awkward size: kernel on the 128-aligned bulk, tiny (<4096 elem) tail
        # in plain jnp (avoids the old jnp.pad + out[:n] full-tensor passes).
        width = max_w
        bulk_n = (n // width) * width
        tail_out = aa_relu_reference(xf[bulk_n:], alpha32, compute_dtype=cdt)
        xf = xf[:bulk_n]

    rows = xf.size // width
    x2 = xf.reshape(rows, width)

    itemsize = jnp.dtype(orig_dtype).itemsize
    sub = max(8, 32 // itemsize)             # sublane tile: 8 f32 / 16 bf16 / 32 i8
    target_rows = max(sub, (_TARGET_BLOCK_BYTES // (width * itemsize)) // sub * sub)

    if rows <= sub:
        block_rows = rows                    # full-extent rows: always legal
    else:
        ub = min(target_rows, (rows // sub) * sub)
        if rows >= 4 * sub:
            # >= 4 grid steps: both TensorCores get work + DMA/compute overlap.
            ub = min(ub, max(sub, (rows // (4 * sub)) * sub))
        # Prefer a block_rows that divides rows exactly -> no masked partial
        # stores on the last grid step.
        block_rows = ub
        for br in range(ub, max(sub, ub // 2) - 1, -sub):
            if rows % br == 0:
                block_rows = br
                break

    grid = (pl.cdiv(rows, block_rows),)

    out2 = pl.pallas_call(
        functools.partial(_aa_relu_kernel, compute_dtype=cdt),
        out_shape=jax.ShapeDtypeStruct((rows, width), orig_dtype),
        grid=grid,
        in_specs=[
            pl.BlockSpec(memory_space=pltpu.SMEM),                 # alpha (1,)
            pl.BlockSpec((block_rows, width), lambda i: (i, 0)),   # x block
        ],
        out_specs=pl.BlockSpec((block_rows, width), lambda i: (i, 0)),
        compiler_params=pltpu.CompilerParams(
            dimension_semantics=("parallel",),
            vmem_limit_bytes=vmem_limit,
        ),
        # When the caller donates x, reuse its HBM buffer for the output
        # (matches PyTorch's in-place forward).  Off by default so non-donated
        # inputs don't pay a defensive copy.
        input_output_aliases=({1: 0} if donate else {}),
    )(alpha32, x2)

    out = out2.reshape(-1)
    if tail_out is not None:
        out = jnp.concatenate([out, tail_out])
    return out.reshape(orig_shape)


if __name__ == "__main__":
    # Deterministic parameter init, matching nn.Parameter(torch.tensor([6.])).
    alpha = jnp.array([6.0], dtype=jnp.float32)
    key = jax.random.PRNGKey(0)
    k1, k2, k3, k4 = jax.random.split(key, 4)

    # 1) NCHW f32 input, scaled so all three regimes (<=0, mid, >alpha*e^{pi/2})
    #    occur.  Matches the module's expected usage.
    x1 = jax.random.normal(k1, (2, 4, 16, 16), dtype=jnp.float32) * 15.0
    o1 = jax.block_until_ready(aa_relu(x1, alpha))
    r1 = aa_relu_reference(x1, alpha)
    assert o1.shape == x1.shape and o1.dtype == x1.dtype
    assert jnp.allclose(o1, r1, atol=2e-5, rtol=1e-5)

    # 2) Odd-sized input exercises the bulk + jnp-tail path (no pad/slice).
    x2 = jax.random.normal(k2, (3, 5, 7, 11), dtype=jnp.float32) * 15.0
    o2 = jax.block_until_ready(aa_relu(x2, alpha))
    r2 = aa_relu_reference(x2, alpha)
    assert o2.shape == x2.shape and o2.dtype == x2.dtype
    assert jnp.allclose(o2, r2, atol=2e-5, rtol=1e-5)

    # 3) Larger f32 input exercises a multi-step (>=4) parallel grid.
    x3 = jax.random.normal(k3, (2, 8, 64, 128), dtype=jnp.float32) * 15.0
    o3 = jax.block_until_ready(aa_relu(x3, alpha))
    r3 = aa_relu_reference(x3, alpha)
    assert o3.shape == x3.shape and o3.dtype == x3.dtype
    assert jnp.allclose(o3, r3, atol=2e-5, rtol=1e-5)

    # 4) bf16 input exercises the bf16 in-register path on v6e/v7x (f32 path
    #    on v5e); compare against a reference mirroring the compute dtype.
    x4 = (jax.random.normal(k4, (2, 4, 16, 16), dtype=jnp.float32) * 15.0
          ).astype(jnp.bfloat16)
    o4 = jax.block_until_ready(aa_relu(x4, alpha))
    cdt4 = jnp.bfloat16 if _tpu_config()[1] else jnp.float32
    r4 = aa_relu_reference(x4, alpha, compute_dtype=cdt4)
    assert o4.shape == x4.shape and o4.dtype == x4.dtype
    assert jnp.allclose(o4.astype(jnp.float32), r4.astype(jnp.float32),
                        atol=0.3, rtol=0.05)

    print("KERNEL_OK")
</pallas_src>

<mosaic_0001>
module attributes {stable_mosaic.version = 11 : i64} {
  func.func @_aa_relu_kernel(%arg0: i32, %arg1: memref<1xf32, #tpu.memory_space<smem>>, %arg2: memref<1x2048xf32, #tpu.memory_space<vmem>>, %arg3: memref<1x2048xf32, #tpu.memory_space<vmem>>) attributes {dimension_semantics = [#tpu.dimension_semantics<parallel>], iteration_bounds = array<i64: 1>, scalar_prefetch = 0 : i64, scratch_operands = 0 : i64, tpu.core_type = #tpu.core_type<tc>, window_params = [{transform_indices = @transform_0, window_bounds = array<i64: 1>}, {transform_indices = @transform_1, window_bounds = array<i64: 1, 2048>}, {transform_indices = @transform_2, window_bounds = array<i64: 1, 2048>}]} {
    %c0 = arith.constant 0 : index
    %0 = memref.load %arg1[%c0] : memref<1xf32, #tpu.memory_space<smem>>
    %cst = arith.constant 1.000000e+00 : f32
    %1 = arith.divf %cst, %0 : f32
    %cst_0 = arith.constant 4.81047726 : f32
    %2 = arith.mulf %0, %cst_0 : f32
    %cst_1 = arith.constant 2.000000e+00 : f32
    %3 = arith.mulf %cst_1, %0 : f32
    %c0_2 = arith.constant 0 : index
    %c0_3 = arith.constant 0 : index
    %4 = vector.load %arg2[%c0_2, %c0_3] : memref<1x2048xf32, #tpu.memory_space<vmem>>, vector<1x2048xf32>
    %5 = vector.broadcast %1 : f32 to vector<1x2048xf32>
    %6 = arith.mulf %4, %5 : vector<1x2048xf32>
    %cst_4 = arith.constant 1.000000e+00 : f32
    %cst_5 = arith.constant 4.81047726 : f32
    %7 = vector.broadcast %cst_4 : f32 to vector<1x2048xf32>
    %8 = arith.maximumf %7, %6 : vector<1x2048xf32>
    %9 = vector.broadcast %cst_5 : f32 to vector<1x2048xf32>
    %10 = arith.minimumf %9, %8 : vector<1x2048xf32>
    %11 = math.log %10 : vector<1x2048xf32>
    %12 = arith.mulf %11, %11 : vector<1x2048xf32>
    %cst_6 = arith.constant 2.58573687E-6 : f32
    %13 = vector.broadcast %cst_6 : f32 to vector<1x2048xf32>
    %14 = arith.mulf %13, %12 : vector<1x2048xf32>
    %cst_7 = arith.constant -1.97993271E-4 : f32
    %15 = vector.broadcast %cst_7 : f32 to vector<1x2048xf32>
    %16 = arith.addf %14, %15 : vector<1x2048xf32>
    %17 = arith.mulf %16, %12 : vector<1x2048xf32>
    %cst_8 = arith.constant 8.332880e-03 : f32
    %18 = vector.broadcast %cst_8 : f32 to vector<1x2048xf32>
    %19 = arith.addf %17, %18 : vector<1x2048xf32>
    %20 = arith.mulf %19, %12 : vector<1x2048xf32>
    %cst_9 = arith.constant -0.166666463 : f32
    %21 = vector.broadcast %cst_9 : f32 to vector<1x2048xf32>
    %22 = arith.addf %20, %21 : vector<1x2048xf32>
    %23 = arith.mulf %22, %12 : vector<1x2048xf32>
    %cst_10 = arith.constant 1.000000e+00 : f32
    %24 = vector.broadcast %cst_10 : f32 to vector<1x2048xf32>
    %25 = arith.addf %23, %24 : vector<1x2048xf32>
    %26 = arith.mulf %11, %25 : vector<1x2048xf32>
    %27 = vector.broadcast %0 : f32 to vector<1x2048xf32>
    %28 = arith.mulf %27, %26 : vector<1x2048xf32>
    %29 = vector.broadcast %0 : f32 to vector<1x2048xf32>
    %30 = arith.addf %28, %29 : vector<1x2048xf32>
    %31 = vector.broadcast %0 : f32 to vector<1x2048xf32>
    %32 = arith.cmpf ogt, %4, %31 : vector<1x2048xf32>
    %33 = vector.broadcast %2 : f32 to vector<1x2048xf32>
    %34 = arith.cmpf olt, %4, %33 : vector<1x2048xf32>
    %35 = arith.andi %32, %34 : vector<1x2048xi1>
    %36 = vector.broadcast %2 : f32 to vector<1x2048xf32>
    %37 = arith.cmpf ogt, %4, %36 : vector<1x2048xf32>
    %cst_11 = arith.constant 0.000000e+00 : f32
    %38 = vector.broadcast %cst_11 : f32 to vector<1x2048xf32>
    %39 = arith.maximumf %4, %38 : vector<1x2048xf32>
    %40 = arith.select %35, %30, %39 : vector<1x2048xi1>, vector<1x2048xf32>
    %41 = vector.broadcast %3 : f32 to vector<1x2048xf32>
    %42 = arith.select %37, %41, %40 : vector<1x2048xi1>, vector<1x2048xf32>
    %c0_12 = arith.constant 0 : index
    %c0_13 = arith.constant 0 : index
    %43 = vector.load %arg3[%c0_12, %c0_13] : memref<1x2048xf32, #tpu.memory_space<vmem>>, vector<1x2048xf32>
    tpu.vector_store %arg3[%c0_12, %c0_13], %42 {strides = array<i32>} : memref<1x2048xf32, #tpu.memory_space<vmem>>, vector<1x2048xf32>,
    return
  }
  func.func @transform_0(%arg0: i32) -> i32 {
    %c0_i32 = arith.constant 0 : i32
    %c0_i32_0 = arith.constant 0 : i32
    return %c0_i32 : i32
  }
  func.func @transform_1(%arg0: i32) -> (i32, i32) {
    %c0_i32 = arith.constant 0 : i32
    %c0_i32_0 = arith.constant 0 : i32
    return %arg0, %c0_i32 : i32, i32
  }
  func.func @transform_2(%arg0: i32) -> (i32, i32) {
    %c0_i32 = arith.constant 0 : i32
    %c0_i32_0 = arith.constant 0 : i32
    return %arg0, %c0_i32 : i32, i32
  }
}

</mosaic_0001>

<bundles_post_ra>
// kernel: tpu_custom_call.1
= control target key start
LH: loop header
LB: loop body
LE: loop exit
PB: predicated region body
PF: predicated region fallthrough
CT: control target
= control target key end

     0   :  { %8 = vsyncpa [#allocation4], 0  ;;  %s188_s0 = inlined_call_operand.<no memory space> [shape: f32[1], index: 0, kind: input, shape index: {}]   ;;  %s189_s1 = inlined_call_operand.hbm [shape: f32[1,2048], index: 1, kind: input, shape index: {}]   ;;  %s190_s2 = inlined_call_operand.hbm [shape: f32[1,2048], index: 2, kind: output, shape index: {}]  }
   0x1   :  { %9 = vsyncpa [#allocation5], 0  ;;  %s156_s9 = smov [#allocation3]  }
   0x2   :  { %s18_s10 = sshll.u32 %s156_s9, 4  ;;  %s19_s10 = int_to_ptr.vmem [resolvable:$true] %s18_s10 }
   0x3   :  { %s120_s11 = scalar_lea.vmem %s19_s10, 256  ;;  %p125_p1 = scmp.lt.s32.totalorder %s19_s10, %s19_s10 }
   0x4   :  { %p121_p0 = scmp.ne.s32.totalorder %s19_s10, %s120_s11  ;;  %p126_p2 = scmp.lt.s32.totalorder %s120_s11, %s120_s11 }
   0x6   :  { %p127_p3 = por %p126_p2, %p125_p1 }
   0x8   :  { %p128_p4 = pnand %p127_p3, %p121_p0 }
   0xa   :  { %131 = shalt.err (!%p128_p4)
}
   0xb   :  { %21 = dma.hbm_to_vmem [thread:$0]  %s189_s1, 256, %s19_s10, [#allocation4]   ;;  %v26_v0 = vstv %s188_s0 }
   0xc   :  { %152 = dma.done.wait [#allocation4], 256  }
   0xd   :  { %153 = vsyncadd [#allocation4], 4294967040  ;;  %106 = vrcp.f32 %v26_v0  ;;  %v31_v2 = vld [vmem:[#allocation3] sm:$0xff]  ;;  %v32_v3 = vld [vmem:[#allocation3 + $0x8] sm:$0xff]  ;;  %s29_s18 = smul.f32 4.8104773, %s188_s0 }
   0xe   :  { %s30_s21 = smul.f32 2.0, %s188_s0  ;;  %vm69_vm0 = vcmp.gt.f32.partialorder %v31_v2, %v26_v0  ;;  %vm70_vm2 = vcmp.gt.f32.partialorder %v32_v3, %v26_v0  ;;  %v78_v37 = vmax.f32 %v31_v2, 0.0  ;;  %v79_v39 = vmax.f32 %v32_v3, 0.0  ;;  %s157_s22 = smov [#allocation6]  }
   0xf   :  { %v71_v31 = vstv %s29_s18  ;;  %s93_s23 = sshll.u32 %s157_s22, 4  ;;  %s94_s23 = int_to_ptr.vmem [resolvable:$true] %s93_s23 }
  0x10   :  { %vm72_vm1 = vcmp.lt.f32.partialorder %v31_v2, %v71_v31  ;;  %vm73_vm3 = vcmp.lt.f32.partialorder %v32_v3, %v71_v31  ;;  %vm76_vm6 = vcmp.gt.f32.partialorder %v31_v2, %v71_v31  ;;  %v82_v41 = vstv %s30_s21  ;;  %s132_s0 = scalar_lea.vmem %s94_s23, 256  ;;  %p137_p6 = scmp.lt.s32.totalorder %s94_s23, %s94_s23 }
  0x11   :  { %vm74_vm4 = vmand %vm69_vm0, %vm72_vm1  ;;  %vm77_vm7 = vcmp.gt.f32.partialorder %v32_v3, %v71_v31  ;;  %p133_p5 = scmp.ne.s32.totalorder %s94_s23, %s132_s0  ;;  %p138_p7 = scmp.lt.s32.totalorder %s132_s0, %s132_s0 }
  0x12   :  { %vm75_vm5 = vmand %vm70_vm2, %vm73_vm3 }
  0x13   :  { %p139_p8 = por %p138_p7, %p137_p6 }
  0x15   :  { %p140_p9 = pnand %p139_p8, %p133_p5 }
  0x1a   :  { %v107_v1 = vpop.eup %106 }
  0x1b   :  { %102 = vpush %v107_v1 }
  0x4c   :  { %s103_s16 = spop %102 }
  0x4d   :  { %v33_v4 = vstv %s103_s16 }
  0x4e   :  { %v34_v5 = vmul.f32 %v33_v4, %v31_v2  ;;  %v35_v6 = vmul.f32 %v33_v4, %v32_v3 }
  0x50   :  { %v36_v7 = vmax.f32 %v34_v5, 1.0  ;;  %v37_v8 = vmax.f32 %v35_v6, 1.0 }
  0x52   :  { %v38_v9 = vmin.f32 %v36_v7, 4.8104773  ;;  %v39_v10 = vmin.f32 %v37_v8, 4.8104773 }
  0x54   :  { %108 = vlog2.f32 %v38_v9 }
  0x55   :  { %110 = vlog2.f32 %v39_v10 }
  0x61   :  { %v109_v11 = vpop.eup %108 }
  0x62   :  { %v111_v12 = vpop.eup %110  ;;  %v41_v13 = vmul.f32 0.6931472, %v109_v11 }
  0x63   :  { %v43_v14 = vmul.f32 0.6931472, %v111_v12 }
  0x64   :  { %v44_v15 = vmul.f32 %v41_v13, %v41_v13 }
  0x65   :  { %v45_v16 = vmul.f32 %v43_v14, %v43_v14 }
  0x66   :  { %v46_v17 = vmul.f32 2.5857369e-06, %v44_v15 }
  0x67   :  { %v47_v18 = vmul.f32 2.5857369e-06, %v45_v16 }
  0x68   :  { %v48_v19 = vadd.f32 -0.00019799327, %v46_v17 }
  0x69   :  { %v49_v20 = vadd.f32 -0.00019799327, %v47_v18 }
  0x6a   :  { %v50_v21 = vmul.f32 %v48_v19, %v44_v15 }
  0x6b   :  { %v51_v22 = vmul.f32 %v49_v20, %v45_v16 }
  0x6c   :  { %v52_v23 = vadd.f32 0.00833288, %v50_v21 }
  0x6d   :  { %v53_v24 = vadd.f32 0.00833288, %v51_v22 }
  0x6e   :  { %v54_v25 = vmul.f32 %v52_v23, %v44_v15 }
  0x6f   :  { %v55_v26 = vmul.f32 %v53_v24, %v45_v16 }
  0x70   :  { %v56_v27 = vadd.f32 -0.16666646, %v54_v25 }
  0x71   :  { %v57_v28 = vadd.f32 -0.16666646, %v55_v26 }
  0x72   :  { %v58_v29 = vmul.f32 %v56_v27, %v44_v15 }
  0x73   :  { %v59_v30 = vmul.f32 %v57_v28, %v45_v16 }
  0x74   :  { %v60_v32 = vadd.f32 1.0, %v58_v29 }
  0x75   :  { %v61_v33 = vadd.f32 1.0, %v59_v30 }
  0x76   :  { %v62_v34 = vmul.f32 %v60_v32, %v41_v13 }
  0x77   :  { %v63_v35 = vmul.f32 %v61_v33, %v43_v14 }
  0x78   :  { %v65_v36 = vmul.f32 %v62_v34, %v26_v0 }
  0x79   :  { %v66_v38 = vmul.f32 %v63_v35, %v26_v0 }
  0x7a   :  { %v67_v40 = vadd.f32 %v65_v36, %v26_v0 }
  0x7b   :  { %v68_v42 = vadd.f32 %v66_v38, %v26_v0 }
  0x7c   :  { %v80_v43 = vsel %vm74_vm4, %v67_v40, %v78_v37 }
  0x7d   :  { %v81_v44 = vsel %vm75_vm5, %v68_v42, %v79_v39  ;;  %v83_v45 = vsel %vm76_vm6, %v82_v41, %v80_v43 }
  0x7e   :  { %v84_v46 = vsel %vm77_vm7, %v82_v41, %v81_v44  ;;  %85 = vst [vmem:[#allocation6] sm:$0xff] %v83_v45 }
  0x7f   :  { %86 = vst [vmem:[#allocation6 + $0x8] sm:$0xff] %v84_v46 }
  0x80   :  { %143 = shalt.err (!%p140_p9)
}
  0x81   :  { %96 = dma.vmem_to_hbm [thread:$0]  %s94_s23, 256, %s190_s2, [#allocation5]  }
  0x82   :  { %154 = dma.done.wait [#allocation5], 256  }
  0x83   :  { %155 = vsyncadd [#allocation5], 4294967040 }
  0x84   :  { %100 = vsyncpa [#allocation4], 1 }
  0x85   :  { %101 = vsyncpa [#allocation5], 1 }

</bundles_post_ra>
